<compile_context>
chip_gen: v7x
topology: tpu7x:2x2x1
jax: 0.10.0
libtpu: 0.0.40
codegen_flags: <defaults>
</compile_context>

<pallas_src>
import functools

import numpy as np
import jax
import jax.numpy as jnp
from jax.experimental import pallas as pl
from jax.experimental.pallas import tpu as pltpu


# -----------------------------------------------------------------------------
# Parameter / grid construction (matches FocalLoss_interaction.__init__)
# -----------------------------------------------------------------------------
PARA = {
    "xmax": 8.0,
    "ymin": 0.0,
    "ymax": 15.0,
    "sigmax": 1.0,
    "sigmay": 2.0,
    "resolution": 1.0,
}


def make_xy_grids(para):
    dx = dy = para["resolution"]
    lateral = np.array(
        [i for i in range(int(-para["xmax"] / dx), int(para["xmax"] / dx) + 1)],
        dtype=np.float32) * dx
    longitudinal = np.array(
        [i for i in range(int(para["ymin"] / dy), int(para["ymax"] / dy) + 1)],
        dtype=np.float32) * dy
    len_x, len_y = lateral.shape[0], longitudinal.shape[0]
    # torch: x = lateral.repeat(len_y, 1).transpose(1, 0) -> (len_x, len_y)
    #        y = longitudinal.repeat(len_x, 1)            -> (len_x, len_y)
    x = np.tile(lateral[:, None], (1, len_y))
    y = np.tile(longitudinal[None, :], (len_x, 1))
    return jnp.asarray(x), jnp.asarray(y)


# -----------------------------------------------------------------------------
# Pallas kernel: all four scalar reductions in one invocation
# -----------------------------------------------------------------------------
def _loss_sums_kernel(t0_ref, x_ref, y_ref, a0_ref, a2_ref, r1_ref, z1_ref,
                      out_ref, *, inv2sx2, inv2sy2):
    """Computes, over the full batch in one step:
         out[0] = sum BCE-with-logits(inputs[0], gaussian_ref)
         out[1] = sum BCE-with-logits(inputs[2], gaussian_ref)
         out[2] = sum |sigmoid(inputs[0]) - sigmoid(inputs[2])|
         out[3] = sum BCE-with-logits(inputs[1], targets[1])
    Layout: heatmaps / coordinate grids are lane-dense (B, Lx*Ly)."""
    xc = t0_ref[:, 0:1]                     # (B, 1)
    yc = t0_ref[:, 1:2]                     # (B, 1)
    x = x_ref[...]                          # (1, N)
    y = y_ref[...]                          # (1, N)
    # Gaussian reference heatmap, broadcast over the whole batch at once.
    ref = jnp.exp(-(x - xc) ** 2 * inv2sx2 - (y - yc) ** 2 * inv2sy2)  # (B, N)

    a0 = a0_ref[...]                        # (B, N)
    a2 = a2_ref[...]                        # (B, N)

    # exp(-|x|) is shared between the stable BCE softplus term and the sigmoid.
    e0 = jnp.exp(-jnp.abs(a0))
    e2 = jnp.exp(-jnp.abs(a2))

    # PyTorch-stable BCE-with-logits: max(x,0) - x*z + log(1 + exp(-|x|))
    bce0 = jnp.sum(jnp.maximum(a0, 0.0) - a0 * ref + jnp.log1p(e0))
    bce2 = jnp.sum(jnp.maximum(a2, 0.0) - a2 * ref + jnp.log1p(e2))

    # sigmoid(x) = where(x >= 0, 1, exp(-|x|)) / (1 + exp(-|x|))
    sig0 = jnp.where(a0 >= 0.0, 1.0, e0) / (1.0 + e0)
    sig2 = jnp.where(a2 >= 0.0, 1.0, e2) / (1.0 + e2)
    l1_sum = jnp.sum(jnp.abs(sig0 - sig2))

    # Fused tiny regression BCE (inputs[1] vs targets[1]).
    r1 = r1_ref[...]
    z1 = z1_ref[...]
    bce1 = jnp.sum(jnp.maximum(r1, 0.0) - r1 * z1
                   + jnp.log1p(jnp.exp(-jnp.abs(r1))))

    out_ref[0] = bce0
    out_ref[1] = bce2
    out_ref[2] = l1_sum
    out_ref[3] = bce1


def loss_reduction_sums(in0, in1, in2, t0, t1, x_flat, y_flat, sigmax, sigmay):
    B = in0.shape[0]
    a0 = in0.reshape(B, -1).astype(jnp.float32)     # (B, Lx*Ly), lane-dense
    a2 = in2.reshape(B, -1).astype(jnp.float32)
    r1 = in1.reshape(1, -1).astype(jnp.float32)
    z1 = t1.reshape(1, -1).astype(jnp.float32)
    t0f = t0.astype(jnp.float32)                    # (B, 2)

    kernel = functools.partial(
        _loss_sums_kernel,
        inv2sx2=float(0.5 / (sigmax ** 2)),
        inv2sy2=float(0.5 / (sigmay ** 2)))

    # No grid: one kernel invocation over the whole (tiny) problem.
    return pl.pallas_call(
        kernel,
        out_shape=jax.ShapeDtypeStruct((4,), jnp.float32),
        in_specs=[pl.BlockSpec(memory_space=pltpu.MemorySpace.VMEM)] * 7,
        out_specs=pl.BlockSpec(memory_space=pltpu.MemorySpace.SMEM),
    )(t0f, x_flat, y_flat, a0, a2, r1, z1)


# -----------------------------------------------------------------------------
# Scalar epilogue (plain JAX; XLA fuses it into one tiny op)
# -----------------------------------------------------------------------------
def _focal_from_bce(bce, alpha=0.25, gamma=2.0):
    return alpha * (1.0 - jnp.exp(-bce)) ** gamma * bce


def overall_loss_reg(inputs, targets, xg, yg, para, lmbd=10000.0):
    in0, in1, in2 = inputs
    t0, t1 = targets

    x_flat = xg.reshape(1, -1).astype(jnp.float32)
    y_flat = yg.reshape(1, -1).astype(jnp.float32)

    sums = loss_reduction_sums(in0, in1, in2, t0, t1, x_flat, y_flat,
                               para["sigmax"], para["sigmay"])
    bce0, bce2, l1_sum, bce1 = sums[0], sums[1], sums[2], sums[3]

    lmain = _focal_from_bce(bce0)          # heatmap_loss(inputs[0], targets[0])
    hreg = _focal_from_bce(bce2)           # heatmap_loss(inputs[2], targets[0])
    lreg = _focal_from_bce(bce1)           # focal of regression BCE

    n_elem = float(in0.size)
    coefficient = (l1_sum / n_elem) * lmbd + 1.0   # L1Loss(reduction='mean')

    return (lmain + lreg / 15.0) * coefficient + hreg


# -----------------------------------------------------------------------------
# Pure-JAX reference (correctness sanity check)
# -----------------------------------------------------------------------------
def reference_loss(inputs, targets, xg, yg, para, lmbd=10000.0):
    in0, in1, in2 = [a.astype(jnp.float32) for a in inputs]
    t0, t1 = [a.astype(jnp.float32) for a in targets]
    sx, sy = para["sigmax"], para["sigmay"]

    xc = t0[:, 0][:, None, None]
    yc = t0[:, 1][:, None, None]
    ref = jnp.exp(-((xg[None] - xc) ** 2) / sx ** 2 / 2.0
                  - ((yg[None] - yc) ** 2) / sy ** 2 / 2.0)

    def bce_sum(x, z):
        return jnp.sum(jnp.maximum(x, 0.0) - x * z
                       + jnp.log1p(jnp.exp(-jnp.abs(x))))

    def focal(b):
        return 0.25 * (1.0 - jnp.exp(-b)) ** 2 * b

    lmain = focal(bce_sum(in0, ref))
    hreg = focal(bce_sum(in2, ref))
    lreg = focal(bce_sum(in1.reshape(-1), t1.reshape(-1)))
    coeff = jnp.mean(jnp.abs(jax.nn.sigmoid(in0) - jax.nn.sigmoid(in2))) * lmbd + 1.0
    return (lmain + lreg / 15.0) * coeff + hreg


# -----------------------------------------------------------------------------
# Demo
# -----------------------------------------------------------------------------
if __name__ == "__main__":
    key = jax.random.PRNGKey(0)
    k0, k1, k2, k3, k4, k5 = jax.random.split(key, 6)

    xg, yg = make_xy_grids(PARA)
    Lx, Ly = xg.shape          # (17, 16) for PARA above
    B = 2

    # inputs[0], inputs[2]: heatmap logits (B, Lx, Ly); inputs[1]: reg logits (B, 2)
    in0 = jax.random.normal(k0, (B, Lx, Ly), dtype=jnp.float32)
    in2 = jax.random.normal(k1, (B, Lx, Ly), dtype=jnp.float32)
    in1 = jax.random.normal(k2, (B, 2), dtype=jnp.float32)

    # targets[0]: gaussian centers (B, 2); targets[1]: BCE targets in [0, 1]
    t0x = jax.random.uniform(k3, (B, 1), minval=-PARA["xmax"], maxval=PARA["xmax"])
    t0y = jax.random.uniform(k5, (B, 1), minval=PARA["ymin"], maxval=PARA["ymax"])
    t0 = jnp.concatenate([t0x, t0y], axis=1).astype(jnp.float32)
    t1 = jax.random.uniform(k4, (B, 2), dtype=jnp.float32)

    inputs = (in0, in1, in2)
    targets = (t0, t1)

    loss = overall_loss_reg(inputs, targets, xg, yg, PARA)
    loss = jax.block_until_ready(loss)

    ref = jax.block_until_ready(reference_loss(inputs, targets, xg, yg, PARA))
    np.testing.assert_allclose(np.asarray(loss), np.asarray(ref),
                               rtol=1e-4, atol=1e-3)

    print("KERNEL_OK")
</pallas_src>

<mosaic_0001>
module attributes {stable_mosaic.version = 11 : i64} {
  func.func @_loss_sums_kernel(%arg0: memref<2x2xf32, #tpu.memory_space<vmem>>, %arg1: memref<1x272xf32, #tpu.memory_space<vmem>>, %arg2: memref<1x272xf32, #tpu.memory_space<vmem>>, %arg3: memref<2x272xf32, #tpu.memory_space<vmem>>, %arg4: memref<2x272xf32, #tpu.memory_space<vmem>>, %arg5: memref<1x4xf32, #tpu.memory_space<vmem>>, %arg6: memref<1x4xf32, #tpu.memory_space<vmem>>, %arg7: memref<4xf32, #tpu.memory_space<smem>>) attributes {dimension_semantics = [], scalar_prefetch = 0 : i64, scratch_operands = 0 : i64, tpu.core_type = #tpu.core_type<tc>} {
    %c0 = arith.constant 0 : index
    %c0_0 = arith.constant 0 : index
    %0 = vector.load %arg0[%c0, %c0_0] : memref<2x2xf32, #tpu.memory_space<vmem>>, vector<2x1xf32>
    %c0_1 = arith.constant 0 : index
    %c1 = arith.constant 1 : index
    %1 = vector.load %arg0[%c0_1, %c1] : memref<2x2xf32, #tpu.memory_space<vmem>>, vector<2x1xf32>
    %c0_2 = arith.constant 0 : index
    %c0_3 = arith.constant 0 : index
    %2 = vector.load %arg1[%c0_2, %c0_3] : memref<1x272xf32, #tpu.memory_space<vmem>>, vector<1x272xf32>
    %c0_4 = arith.constant 0 : index
    %c0_5 = arith.constant 0 : index
    %3 = vector.load %arg2[%c0_4, %c0_5] : memref<1x272xf32, #tpu.memory_space<vmem>>, vector<1x272xf32>
    %4 = vector.broadcast %2 : vector<1x272xf32> to vector<2x272xf32>
    %5 = vector.broadcast %0 : vector<2x1xf32> to vector<2x272xf32>
    %6 = arith.subf %4, %5 : vector<2x272xf32>
    %7 = arith.mulf %6, %6 : vector<2x272xf32>
    %cst = arith.constant 0.000000e+00 : f32
    %8 = vector.broadcast %cst : f32 to vector<2x272xf32>
    %9 = arith.subf %8, %7 : vector<2x272xf32>
    %cst_6 = arith.constant 5.000000e-01 : f32
    %10 = vector.broadcast %cst_6 : f32 to vector<2x272xf32>
    %11 = arith.mulf %9, %10 : vector<2x272xf32>
    %12 = vector.broadcast %3 : vector<1x272xf32> to vector<2x272xf32>
    %13 = vector.broadcast %1 : vector<2x1xf32> to vector<2x272xf32>
    %14 = arith.subf %12, %13 : vector<2x272xf32>
    %15 = arith.mulf %14, %14 : vector<2x272xf32>
    %cst_7 = arith.constant 1.250000e-01 : f32
    %16 = vector.broadcast %cst_7 : f32 to vector<2x272xf32>
    %17 = arith.mulf %15, %16 : vector<2x272xf32>
    %18 = arith.subf %11, %17 : vector<2x272xf32>
    %19 = math.exp %18 : vector<2x272xf32>
    %c0_8 = arith.constant 0 : index
    %c0_9 = arith.constant 0 : index
    %20 = vector.load %arg3[%c0_8, %c0_9] : memref<2x272xf32, #tpu.memory_space<vmem>>, vector<2x272xf32>
    %c0_10 = arith.constant 0 : index
    %c0_11 = arith.constant 0 : index
    %21 = vector.load %arg4[%c0_10, %c0_11] : memref<2x272xf32, #tpu.memory_space<vmem>>, vector<2x272xf32>
    %22 = math.absf %20 : vector<2x272xf32>
    %cst_12 = arith.constant 0.000000e+00 : f32
    %23 = vector.broadcast %cst_12 : f32 to vector<2x272xf32>
    %24 = arith.subf %23, %22 : vector<2x272xf32>
    %25 = math.exp %24 : vector<2x272xf32>
    %26 = math.absf %21 : vector<2x272xf32>
    %cst_13 = arith.constant 0.000000e+00 : f32
    %27 = vector.broadcast %cst_13 : f32 to vector<2x272xf32>
    %28 = arith.subf %27, %26 : vector<2x272xf32>
    %29 = math.exp %28 : vector<2x272xf32>
    %cst_14 = arith.constant 0.000000e+00 : f32
    %30 = vector.broadcast %cst_14 : f32 to vector<2x272xf32>
    %31 = arith.maximumf %20, %30 : vector<2x272xf32>
    %32 = arith.mulf %20, %19 : vector<2x272xf32>
    %33 = arith.subf %31, %32 : vector<2x272xf32>
    %34 = math.log1p %25 : vector<2x272xf32>
    %35 = arith.addf %33, %34 : vector<2x272xf32>
    %36 = vector.shape_cast %35 : vector<2x272xf32> to vector<1x2x272xf32>
    %cst_15 = arith.constant dense<0.000000e+00> : vector<1xf32>
    %37 = vector.multi_reduction <add>, %36, %cst_15 [1, 2] : vector<1x2x272xf32> to vector<1xf32>
    %38 = vector.shape_cast %37 : vector<1xf32> to vector<1x1x1xf32>
    %39 = vector.extract %38[0, 0, 0] : f32 from vector<1x1x1xf32>
    %cst_16 = arith.constant 0.000000e+00 : f32
    %40 = vector.broadcast %cst_16 : f32 to vector<2x272xf32>
    %41 = arith.maximumf %21, %40 : vector<2x272xf32>
    %42 = arith.mulf %21, %19 : vector<2x272xf32>
    %43 = arith.subf %41, %42 : vector<2x272xf32>
    %44 = math.log1p %29 : vector<2x272xf32>
    %45 = arith.addf %43, %44 : vector<2x272xf32>
    %46 = vector.shape_cast %45 : vector<2x272xf32> to vector<1x2x272xf32>
    %cst_17 = arith.constant dense<0.000000e+00> : vector<1xf32>
    %47 = vector.multi_reduction <add>, %46, %cst_17 [1, 2] : vector<1x2x272xf32> to vector<1xf32>
    %48 = vector.shape_cast %47 : vector<1xf32> to vector<1x1x1xf32>
    %49 = vector.extract %48[0, 0, 0] : f32 from vector<1x1x1xf32>
    %cst_18 = arith.constant 0.000000e+00 : f32
    %50 = vector.broadcast %cst_18 : f32 to vector<2x272xf32>
    %51 = arith.cmpf oge, %20, %50 : vector<2x272xf32>
    %cst_19 = arith.constant 1.000000e+00 : f32
    %52 = vector.broadcast %cst_19 : f32 to vector<2x272xf32>
    %53 = arith.select %51, %52, %25 : vector<2x272xi1>, vector<2x272xf32>
    %cst_20 = arith.constant 1.000000e+00 : f32
    %54 = vector.broadcast %cst_20 : f32 to vector<2x272xf32>
    %55 = arith.addf %54, %25 : vector<2x272xf32>
    %56 = arith.divf %53, %55 : vector<2x272xf32>
    %cst_21 = arith.constant 0.000000e+00 : f32
    %57 = vector.broadcast %cst_21 : f32 to vector<2x272xf32>
    %58 = arith.cmpf oge, %21, %57 : vector<2x272xf32>
    %cst_22 = arith.constant 1.000000e+00 : f32
    %59 = vector.broadcast %cst_22 : f32 to vector<2x272xf32>
    %60 = arith.select %58, %59, %29 : vector<2x272xi1>, vector<2x272xf32>
    %cst_23 = arith.constant 1.000000e+00 : f32
    %61 = vector.broadcast %cst_23 : f32 to vector<2x272xf32>
    %62 = arith.addf %61, %29 : vector<2x272xf32>
    %63 = arith.divf %60, %62 : vector<2x272xf32>
    %64 = arith.subf %56, %63 : vector<2x272xf32>
    %65 = math.absf %64 : vector<2x272xf32>
    %66 = vector.shape_cast %65 : vector<2x272xf32> to vector<1x2x272xf32>
    %cst_24 = arith.constant dense<0.000000e+00> : vector<1xf32>
    %67 = vector.multi_reduction <add>, %66, %cst_24 [1, 2] : vector<1x2x272xf32> to vector<1xf32>
    %68 = vector.shape_cast %67 : vector<1xf32> to vector<1x1x1xf32>
    %69 = vector.extract %68[0, 0, 0] : f32 from vector<1x1x1xf32>
    %c0_25 = arith.constant 0 : index
    %c0_26 = arith.constant 0 : index
    %70 = vector.load %arg5[%c0_25, %c0_26] : memref<1x4xf32, #tpu.memory_space<vmem>>, vector<1x4xf32>
    %c0_27 = arith.constant 0 : index
    %c0_28 = arith.constant 0 : index
    %71 = vector.load %arg6[%c0_27, %c0_28] : memref<1x4xf32, #tpu.memory_space<vmem>>, vector<1x4xf32>
    %cst_29 = arith.constant 0.000000e+00 : f32
    %72 = vector.broadcast %cst_29 : f32 to vector<1x4xf32>
    %73 = arith.maximumf %70, %72 : vector<1x4xf32>
    %74 = arith.mulf %70, %71 : vector<1x4xf32>
    %75 = arith.subf %73, %74 : vector<1x4xf32>
    %76 = math.absf %70 : vector<1x4xf32>
    %cst_30 = arith.constant 0.000000e+00 : f32
    %77 = vector.broadcast %cst_30 : f32 to vector<1x4xf32>
    %78 = arith.subf %77, %76 : vector<1x4xf32>
    %79 = math.exp %78 : vector<1x4xf32>
    %80 = math.log1p %79 : vector<1x4xf32>
    %81 = arith.addf %75, %80 : vector<1x4xf32>
    %82 = vector.shape_cast %81 : vector<1x4xf32> to vector<1x1x4xf32>
    %cst_31 = arith.constant dense<0.000000e+00> : vector<1xf32>
    %83 = vector.multi_reduction <add>, %82, %cst_31 [1, 2] : vector<1x1x4xf32> to vector<1xf32>
    %84 = vector.shape_cast %83 : vector<1xf32> to vector<1x1x1xf32>
    %85 = vector.extract %84[0, 0, 0] : f32 from vector<1x1x1xf32>
    %c0_32 = arith.constant 0 : index
    %86 = memref.load %arg7[%c0_32] : memref<4xf32, #tpu.memory_space<smem>>
    memref.store %39, %arg7[%c0_32] : memref<4xf32, #tpu.memory_space<smem>>
    %c1_33 = arith.constant 1 : index
    %87 = memref.load %arg7[%c1_33] : memref<4xf32, #tpu.memory_space<smem>>
    memref.store %49, %arg7[%c1_33] : memref<4xf32, #tpu.memory_space<smem>>
    %c2 = arith.constant 2 : index
    %88 = memref.load %arg7[%c2] : memref<4xf32, #tpu.memory_space<smem>>
    memref.store %69, %arg7[%c2] : memref<4xf32, #tpu.memory_space<smem>>
    %c3 = arith.constant 3 : index
    %89 = memref.load %arg7[%c3] : memref<4xf32, #tpu.memory_space<smem>>
    memref.store %85, %arg7[%c3] : memref<4xf32, #tpu.memory_space<smem>>
    return
  }
}

</mosaic_0001>

<bundles_post_ra>
// kernel: tpu_custom_call.1
= control target key start
LH: loop header
LB: loop body
LE: loop exit
PB: predicated region body
PF: predicated region fallthrough
CT: control target
= control target key end

     0   :  { %12 = vsyncpa [#allocation3], 0  ;;  %s579_s0 = inlined_call_operand.hbm [shape: f32[2,2], index: 0, kind: input, shape index: {}]   ;;  %s580_s1 = inlined_call_operand.vmem [shape: f32[1,272], index: 1, kind: input, shape index: {}]   ;;  %s581_s2 = inlined_call_operand.hbm [shape: f32[1,272], index: 2, kind: input, shape index: {}]   ;;  %s582_s3 = inlined_call_operand.vmem [shape: f32[2,272], index: 3, kind: input, shape index: {}]   ;;  %s583_s4 = inlined_call_operand.vmem [shape: f32[2,272], index: 4, kind: input, shape index: {}]   ;;  %s584_s5 = inlined_call_operand.vmem [shape: f32[1,4], index: 5, kind: input, shape index: {}]   ;;  %s585_s6 = inlined_call_operand.vmem [shape: f32[1,4], index: 6, kind: input, shape index: {}]   ;;  %s586_s7 = inlined_call_operand.hbm [shape: f32[4], index: 7, kind: output, shape index: {}]  }
   0x1   :  { %13 = vsyncpa [#allocation6], 0 }
   0x2   :  { %14 = vsyncpa [#allocation4], 0  ;;  %s448_s24 = smov [#allocation2]   ;;  %s449_s26 = smov [#allocation5]  }
   0x3   :  { %s21_s25 = sshll.u32 %s448_s24, 4  ;;  %s33_s27 = sshll.u32 %s449_s26, 4  ;;  %s22_s25 = int_to_ptr.vmem [resolvable:$true] %s21_s25  ;;  %s34_s27 = int_to_ptr.vmem [resolvable:$true] %s33_s27 }
   0x4   :  { %s388_s30 = scalar_lea.hbm %s579_s0, 32 }
   0x5   :  { %p389_p0 = scmp.ne.s32.totalorder %s579_s0, %s388_s30  ;;  %p392_p1 = scmp.lt.u32.totalorder %s388_s30, %s579_s0 }
   0x7   :  { %p394_p2 = pnand %p392_p1, %p389_p0 }
   0x9   :  { %397 = shalt.err (!%p394_p2)
}
   0xa   :  { %s398_s12 = scalar_lea.vmem %s22_s25, 32  ;;  %p403_p4 = scmp.lt.s32.totalorder %s22_s25, %s22_s25 }
   0xb   :  { %p399_p3 = scmp.ne.s32.totalorder %s22_s25, %s398_s12  ;;  %p404_p5 = scmp.lt.s32.totalorder %s398_s12, %s398_s12 }
   0xd   :  { %p405_p6 = por %p404_p5, %p403_p4 }
   0xf   :  { %p406_p7 = pnand %p405_p6, %p399_p3 }
  0x11   :  { %409 = shalt.err (!%p406_p7)
}
  0x12   :  { %24 = dma.hbm_to_vmem [thread:$0]  %s579_s0, 32, %s22_s25, [#allocation3]  }
  0x13   :  { %s410_s17 = scalar_lea.hbm %s581_s2, 48 }
  0x14   :  { %p411_p8 = scmp.ne.s32.totalorder %s581_s2, %s410_s17  ;;  %p414_p9 = scmp.lt.u32.totalorder %s410_s17, %s581_s2 }
  0x16   :  { %p416_p10 = pnand %p414_p9, %p411_p8 }
  0x18   :  { %419 = shalt.err (!%p416_p10)
}
  0x19   :  { %s420_s22 = scalar_lea.vmem %s34_s27, 48  ;;  %s424_s23 = scalar_lea.vmem %s34_s27, 64 }
  0x1a   :  { %p421_p11 = scmp.ne.s32.totalorder %s34_s27, %s420_s22  ;;  %p425_p12 = scmp.lt.s32.totalorder %s34_s27, %s34_s27 }
  0x1b   :  { %p426_p13 = scmp.lt.s32.totalorder %s424_s23, %s420_s22 }
  0x1d   :  { %p427_p0 = por %p426_p13, %p425_p12 }
  0x1f   :  { %p428_p1 = pnand %p427_p0, %p421_p11 }
  0x21   :  { %431 = shalt.err (!%p428_p1)
}
  0x22   :  { %36 = dma.hbm_to_vmem [thread:$0]  %s581_s2, 48, %s34_s27, [#allocation6]  }
  0x23   :  { %442 = dma.done.wait [#allocation3], 32  }
  0x24   :  { %443 = vsyncadd [#allocation3], 4294967264 }
  0x25   :  { %444 = dma.done.wait [#allocation6], 48  }
  0x26   :  { %445 = vsyncadd [#allocation6], 4294967248  ;;  %v450_v0 = vmov 0   ;;  %v51_v1 = vld [vmem:[#allocation2] sm:$0x3]  ;;  %v451_v2 = vmov 1   ;;  %v55_v25 = vlaneseq }
  0x27   :  { %364 = vset.pattern.permute.xlu0 %v450_v0  ;;  %v297_v3 = vld [vmem:[%s584_s5] sm:$0x1]  ;;  %vm316_vm1 = vcmask 24576   ;;  %v53_v39 = vld [vmem:[#allocation5] sm:$0x7]  ;;  %vm188_vm6 = vcmask 1041408  }
  0x28   :  { %72 = vperm.xlu0 %364, %v51_v1   ;;  %v302_v4 = vand.u32 2147483647, %v297_v3  ;;  %v298_v10 = vld [vmem:[%s585_s6] sm:$0x1]  ;;  %v299_v13 = vmax.f32 %v297_v3, 0.0  ;;  %v536_v28 = vshrl.u32 %v55_v25, 7 }
  0x29   :  { %v300_v14 = vmul.f32 %v298_v10, %v297_v3  ;;  %v527_v22 = vld [vmem:[%s582_s3] sm:$0x3f]  ;;  %vm192_vm7 = vcmask 123904   ;;  %s432_s12 = scalar_lea.hbm %s586_s7, 16 }
  0x2a   :  { %v303_v5 = vsub.f32 0.0, %v302_v4  ;;  %v532_v23 = vld [vmem:[%s583_s4] sm:$0x3f]  ;;  %v127_v24 = vand.u32 2147483647, %v527_v22  ;;  %v57_v31 = vsub.s32 0, %v536_v28  ;;  %p433_p2 = scmp.ne.s32.totalorder %s586_s7, %s432_s12  ;;  %p436_p3 = scmp.lt.u32.totalorder %s432_s12, %s586_s7 }
  0x2b   :  { %v301_v18 = vsub.f32 %v299_v13, %v300_v14  ;;  %v131_v26 = vand.u32 2147483647, %v532_v23  ;;  %v61_v32 = vsub.s32 1, %v536_v28  ;;  %v65_v33 = vsub.s32 2, %v536_v28  ;;  %v52_v34 = vld [vmem:[%s580_s1] sm:$0x7] }
  0x2c   :  { %365 = vset.pattern.permute.xlu0 %v451_v2  ;;  %v304_v6 = vmul.f32 1.442695, %v303_v5  ;;  %v128_v27 = vsub.f32 0.0, %v127_v24  ;;  %v58_v36 = vrot.slane %v52_v34, %v57_v31  ;;  %v91_v44 = vrot.slane %v53_v39, %v57_v31  ;;  %p438_p4 = pnand %p436_p3, %p433_p2 }
  0x2d   :  { %104 = vperm.xlu0 %365, %v51_v1   ;;  %v132_v29 = vsub.f32 0.0, %v131_v26  ;;  %v62_v37 = vrot.slane %v52_v34, %v61_v32  ;;  %v66_v38 = vrot.slane %v52_v34, %v65_v33  ;;  %v95_v45 = vrot.slane %v53_v39, %v61_v32 }
  0x2e   :  { %366 = vpow2.f32 %v304_v6  ;;  %v129_v30 = vmul.f32 1.442695, %v128_v27  ;;  %v99_v46 = vrot.slane %v53_v39, %v65_v33  ;;  %vm251_vm2 = vcmp.ge.f32.partialorder %v527_v22, 0.0 }
  0x2f   :  { %v133_v35 = vmul.f32 1.442695, %v132_v29  ;;  %vm256_vm3 = vcmp.ge.f32.partialorder %v532_v23, 0.0 }
  0x38   :  { %v367_v7 = vpop.eup %366 }
  0x39   :  { %v306_v8 = vadd.f32 1.0, %v367_v7  ;;  %v309_v9 = vmul.f32 -0.5, %v367_v7  ;;  %v312_v15 = vand.u32 2147483647, %v367_v7 }
  0x3b   :  { %368 = vlog2.f32 %v306_v8  ;;  %v310_v11 = vadd.f32 1.0, %v309_v9  ;;  %vm313_vm0 = vcmp.lt.f32.partialorder %v312_v15, 0.0004427343 }
  0x3c   :  { %370 = vpow2.f32 %v129_v30 }
  0x3d   :  { %v311_v17 = vmul.f32 %v367_v7, %v310_v11  ;;  %372 = vpow2.f32 %v133_v35 }
  0x45   :  { %v369_v12 = vpop.eup %368 }
  0x46   :  { %v308_v16 = vmul.f32 0.6931472, %v369_v12  ;;  %v544_v53 = vpop.eup %370  ;;  %v452_v12 = vmov 1983009808  }
  0x47   :  { %v373_v58 = vpop.eup %372  ;;  %v158_v0 = vadd.f32 1.0, %v544_v53  ;;  %v141_v13 = vunpack.c.l.s4 %v452_v12  ;;  %v164_v35 = vand.u32 2147483647, %v544_v53 }
  0x48   :  { %v314_v19 = vsel %vm313_vm0, %v311_v17, %v308_v16  ;;  %v207_v5 = vadd.f32 1.0, %v373_v58  ;;  %v161_v17 = vmul.f32 -0.5, %v544_v53 }
  0x49   :  { %v315_v20 = vadd.f32 %v314_v19, %v301_v18  ;;  %374 = vrcp.f32 %v158_v0  ;;  %v142_v15 = vunpack.c.0.s8 %v141_v13  ;;  %v210_v18 = vmul.f32 -0.5, %v373_v58 }
  0x4a   :  { %376 = vrcp.f32 %v207_v5  ;;  %v252_v19 = vsel %vm251_vm2, 1.0, %v544_v53  ;;  %v162_v31 = vadd.f32 1.0, %v161_v17  ;;  %vm165_vm4 = vcmp.lt.f32.partialorder %v164_v35, 0.0004427343 }
  0x4b   :  { %v317_v21 = vsel %vm316_vm1, %v315_v20, 0.0  ;;  %378 = vlog2.f32 %v158_v0  ;;  %v257_v20 = vsel %vm256_vm3, 1.0, %v373_v58  ;;  %v145_v26 = vsub.s32 %v142_v15, %v536_v28 }
  0x4c   :  { %318 = vadd.xlane.f32.xlu0 %v317_v21  ;;  %380 = vlog2.f32 %v207_v5  ;;  %v211_v32 = vadd.f32 1.0, %v210_v18 }
  0x4e   :  { %v212_v28 = vmul.f32 %v373_v58, %v211_v32 }
  0x53   :  { %v375_v14 = vpop.eup %374 }
  0x54   :  { %v377_v16 = vpop.eup %376  ;;  %v255_v27 = vmul.f32 %v375_v14, %v252_v19 }
  0x55   :  { %v379_v21 = vpop.eup %378  ;;  %v260_v29 = vmul.f32 %v377_v16, %v257_v20 }
  0x56   :  { %v381_v24 = vpop.eup %380 }
  0xa7   :  { %v73_v40 = vpop.permute.xlu0 %72 }
  0xa8   :  { %v75_v41 = vsub.f32 %v58_v36, %v73_v40  ;;  %v76_v42 = vsub.f32 %v62_v37, %v73_v40  ;;  %v77_v43 = vsub.f32 %v66_v38, %v73_v40  ;;  %v213_v36 = vand.u32 2147483647, %v373_v58 }
  0xa9   :  { %v135_v37 = vmax.f32 %v527_v22, 0.0  ;;  %v261_v40 = vsub.f32 %v255_v27, %v260_v29 }
  0xaa   :  { %v78_v47 = vmul.f32 %v75_v41, %v75_v41  ;;  %v79_v48 = vmul.f32 %v76_v42, %v76_v42  ;;  %v80_v49 = vmul.f32 %v77_v43, %v77_v43  ;;  %v160_v41 = vmul.f32 0.6931472, %v379_v21 }
  0xab   :  { %v163_v42 = vmul.f32 %v544_v53, %v162_v31  ;;  %v209_v43 = vmul.f32 0.6931472, %v381_v24  ;;  %vm214_vm5 = vcmp.lt.f32.partialorder %v213_v36, 0.0004427343 }
  0xac   :  { %v81_v50 = vsub.f32 0.0, %v78_v47  ;;  %v82_v51 = vsub.f32 0.0, %v79_v48  ;;  %v105_v52 = vpop.permute.xlu0 %104  ;;  %v83_v54 = vsub.f32 0.0, %v80_v49  ;;  %v262_v48 = vand.u32 2147483647, %v261_v40 }
  0xad   :  { %v107_v55 = vsub.f32 %v91_v44, %v105_v52  ;;  %v108_v56 = vsub.f32 %v95_v45, %v105_v52  ;;  %v109_v57 = vsub.f32 %v99_v46, %v105_v52  ;;  %v204_v45 = vmax.f32 %v532_v23, 0.0 }
  0xae   :  { %v84_v62 = vmul.f32 0.5, %v81_v50  ;;  %v85_v63 = vmul.f32 0.5, %v82_v51  ;;  %v86_v1 = vmul.f32 0.5, %v83_v54  ;;  %v166_v49 = vsel %vm165_vm4, %v163_v42, %v160_v41 }
  0xaf   :  { %v110_v59 = vmul.f32 %v107_v55, %v107_v55  ;;  %v111_v60 = vmul.f32 %v108_v56, %v108_v56  ;;  %v112_v61 = vmul.f32 %v109_v57, %v109_v57  ;;  %v215_v50 = vsel %vm214_vm5, %v212_v28, %v209_v43 }
  0xb0   :  { %v271_v56 = vrot.slane %v262_v48, %v145_v26 }
  0xb1   :  { %v113_v2 = vmul.f32 0.125, %v110_v59  ;;  %v114_v3 = vmul.f32 0.125, %v111_v60  ;;  %v115_v4 = vmul.f32 0.125, %v112_v61  ;;  %v264_v59 = vcombine.high %v262_v48, %v262_v48 }
  0xb3   :  { %v116_v6 = vsub.f32 %v84_v62, %v113_v2  ;;  %v117_v7 = vsub.f32 %v85_v63, %v114_v3  ;;  %v118_v8 = vsub.f32 %v86_v1, %v115_v4  ;;  %v279_v63 = vcombine.high %v271_v56, %v271_v56 }
  0xb4   :  { %v278_v3 = vrot.slane %v264_v59, %v145_v26  ;;  %v283_v4 = vsel %vm188_vm6, %v271_v56, 0.0 }
  0xb5   :  { %v119_v9 = vmul.f32 1.442695, %v116_v6  ;;  %v121_v10 = vmul.f32 1.442695, %v117_v7  ;;  %v123_v11 = vmul.f32 1.442695, %v118_v8 }
  0xb6   :  { %v284_v8 = vsel %vm188_vm6, %v279_v63, 0.0  ;;  %v286_v13 = vsel %vm192_vm7, %v278_v3, 0.0 }
  0xb7   :  { %382 = vpow2.f32 %v119_v9 }
  0xb8   :  { %384 = vpow2.f32 %v121_v10 }
  0xb9   :  { %386 = vpow2.f32 %v123_v11  ;;  %v285_v11 = vadd.f32 %v284_v8, %v283_v4 }
  0xbb   :  { %v287_v15 = vadd.f32 %v286_v13, %v285_v11 }
  0xc1   :  { %v383_v25 = vpop.eup %382 }
  0xc2   :  { %v385_v30 = vpop.eup %384 }
  0xc3   :  { %v387_v33 = vpop.eup %386  ;;  %v139_v34 = vcombine.low %v383_v25, %v385_v30 }
  0xc4   :  { %v153_v39 = vrot.slane %v387_v33, %v145_v26 }
  0xc5   :  { %v146_v38 = vrot.slane %v139_v34, %v145_v26 }
  0xc7   :  { %v154_v44 = vcombine.low %v146_v38, %v153_v39 }
  0xc9   :  { %v156_v46 = vmul.f32 %v154_v44, %v527_v22  ;;  %v205_v47 = vmul.f32 %v154_v44, %v532_v23 }
  0xcb   :  { %v157_v51 = vsub.f32 %v135_v37, %v156_v46  ;;  %v206_v52 = vsub.f32 %v204_v45, %v205_v47 }
  0xcd   :  { %v167_v54 = vadd.f32 %v166_v49, %v157_v51  ;;  %v216_v55 = vadd.f32 %v215_v50, %v206_v52 }
  0xcf   :  { %v169_v53 = vcombine.high %v167_v54, %v167_v54  ;;  %v176_v57 = vrot.slane %v167_v54, %v145_v26  ;;  %v225_v58 = vrot.slane %v216_v55, %v145_v26  ;;  %v218_v62 = vcombine.high %v216_v55, %v216_v55 }
  0xd1   :  { %v183_v60 = vrot.slane %v169_v53, %v145_v26  ;;  %v184_v61 = vcombine.high %v176_v57, %v176_v57  ;;  %v233_v22 = vcombine.high %v225_v58, %v225_v58  ;;  %v189_v23 = vsel %vm188_vm6, %v176_v57, 0.0 }
  0xd2   :  { %v232_v6 = vrot.slane %v218_v62, %v145_v26  ;;  %v237_v7 = vsel %vm188_vm6, %v225_v58, 0.0 }
  0xd3   :  { %v190_v0 = vsel %vm188_vm6, %v184_v61, 0.0  ;;  %v238_v2 = vsel %vm188_vm6, %v233_v22, 0.0  ;;  %v193_v5 = vsel %vm192_vm7, %v183_v60, 0.0 }
  0xd4   :  { %v191_v1 = vadd.f32 %v190_v0, %v189_v23  ;;  %v239_v10 = vadd.f32 %v238_v2, %v237_v7  ;;  %v240_v12 = vsel %vm192_vm7, %v232_v6, 0.0 }
  0xd6   :  { %v194_v9 = vadd.f32 %v193_v5, %v191_v1  ;;  %v241_v14 = vadd.f32 %v240_v12, %v239_v10 }
  0xd8   :  { %195 = vadd.xlane.f32.xlu1 %v194_v9 }
  0xd9   :  { %v319_v16 = vpop.xlane.xlu0 %318 }
  0xda   :  { %v320_v18 = vrot.slane %v319_v16, 4 }
  0xdc   :  { %242 = vadd.xlane.f32.xlu1 %v241_v14  ;;  %v321_v21 = vadd.f32 %v320_v18, %v319_v16 }
  0xde   :  { %v322_v30 = vrot.slane %v321_v21, 2 }
  0xe0   :  { %288 = vadd.xlane.f32.xlu1 %v287_v15  ;;  %v323_v38 = vadd.f32 %v322_v30, %v321_v21 }
  0xe2   :  { %v324_v43 = vrot.slane %v323_v38, 1 }
  0xe4   :  { %v325_v45 = vadd.f32 %v324_v43, %v323_v38 }
 0x165   :  { %v196_v17 = vpop.xlane.xlu1 %195 }
 0x166   :  { %v197_v19 = vrot.slane %v196_v17, 4 }
 0x168   :  { %v198_v20 = vadd.f32 %v197_v19, %v196_v17 }
 0x169   :  { %v243_v24 = vpop.xlane.xlu1 %242 }
 0x16a   :  { %v199_v25 = vrot.slane %v198_v20, 2  ;;  %v244_v26 = vrot.slane %v243_v24, 4 }
 0x16c   :  { %v245_v27 = vadd.f32 %v244_v26, %v243_v24  ;;  %v200_v29 = vadd.f32 %v199_v25, %v198_v20 }
 0x16d   :  { %v289_v31 = vpop.xlane.xlu1 %288 }
 0x16e   :  { %v246_v32 = vrot.slane %v245_v27, 2  ;;  %v290_v33 = vrot.slane %v289_v31, 4  ;;  %v201_v34 = vrot.slane %v200_v29, 1 }
 0x170   :  { %v291_v35 = vadd.f32 %v290_v33, %v289_v31  ;;  %v202_v36 = vadd.f32 %v201_v34, %v200_v29  ;;  %v247_v37 = vadd.f32 %v246_v32, %v245_v27 }
 0x172   :  { %v292_v39 = vrot.slane %v291_v35, 2  ;;  %350 = vpush %v202_v36  ;;  %v248_v40 = vrot.slane %v247_v37, 1 }
 0x174   :  { %v293_v41 = vadd.f32 %v292_v39, %v291_v35  ;;  %v249_v42 = vadd.f32 %v248_v40, %v247_v37 }
 0x176   :  { %352 = vpush %v249_v42  ;;  %v294_v28 = vrot.slane %v293_v41, 1 }
 0x178   :  { %v295_v44 = vadd.f32 %v294_v28, %v293_v41 }
 0x17a   :  { %354 = vpush %v295_v44 }
 0x17b   :  { %356 = vpush %v325_v45 }
 0x1a3   :  { %s351_s1 = spop %350 }
 0x1a4   :  { %328 = sst [smem:[#allocation7]] %s351_s1 }
 0x1a7   :  { %s353_s4 = spop %352 }
 0x1a8   :  { %330 = sst [smem:[#allocation7 + $0x1]] %s353_s4 }
 0x1ab   :  { %s355_s8 = spop %354 }
 0x1ac   :  { %332 = sst [smem:[#allocation7 + $0x2]] %s355_s8  ;;  %s357_s9 = spop %356 }
 0x1ad   :  { %334 = sst [smem:[#allocation7 + $0x3]] %s357_s9 }
 0x1ae   :  { %441 = shalt.err (!%p438_p4)
}
 0x1af   :  { %s453_s17 = smov [#allocation7]  }
 0x1b0   :  { %342 = dma.smem_to_hbm %s453_s17, 16, %s586_s7, [#allocation4]  }
 0x1b1   :  { %446 = dma.done.wait [#allocation4], 16  }
 0x1b2   :  { %447 = vsyncadd [#allocation4], 4294967280 }
 0x1b3   :  { %346 = sfence }
 0x1b4   :  { %347 = vsyncpa [#allocation3], 1 }
 0x1b5   :  { %348 = vsyncpa [#allocation6], 1 }
 0x1b6   :  { %349 = vsyncpa [#allocation4], 1 }

</bundles_post_ra>
